<compile_context>
chip_gen: v6e
topology: v6e:2x2x1
jax: 0.10.0
libtpu: 0.0.40
codegen_flags: <defaults>
</compile_context>

<pallas_src>
import jax
import jax.numpy as jnp
from jax.experimental import pallas as pl
from jax.experimental.pallas import tpu as pltpu

EPS = 1e-5
HID = 128       # hidden width of fc1/fc2 outputs
OUT_PAD = 128   # fc3 output padded from 10 -> 128 lanes (lane-dense store)


def network_a_kernel(x_ref, w1_ref, w23_ref, vec_ref, o_ref):
    inv_n = 1.0 / float(x_ref.shape[0])

    # One DMA for all the small per-feature vectors; slice rows statically.
    vecs = vec_ref[...]                       # (8, 128) fp32
    g1, be1 = vecs[0:1, :], vecs[1:2, :]
    g2, be2 = vecs[2:3, :], vecs[3:4, :]
    b3 = vecs[4:5, :]

    # One DMA for fc2 + fc3 weights; static lane slices are free.
    w23 = w23_ref[...]                        # (128, 256) bf16
    w2 = w23[:, :HID]
    w3 = w23[:, HID:]

    def bn_relu(h, g, be):
        # Fused single-pass batch statistics (fp32 throughout).
        s = jnp.sum(h, axis=0, keepdims=True)
        ss = jnp.sum(h * h, axis=0, keepdims=True)
        mu = s * inv_n
        var = ss * inv_n - mu * mu            # biased variance (PyTorch train mode)
        h = (h - mu) * (jax.lax.rsqrt(var + EPS) * g) + be
        return jnp.maximum(h, 0.0)

    # fc1 (bias dropped: cancels in BN mean subtraction) + bn1 + relu.
    # x arrives fp32; cast to bf16 in-kernel (VPU slack under the MXU).
    h = jnp.dot(x_ref[...].astype(jnp.bfloat16), w1_ref[...],
                preferred_element_type=jnp.float32)
    h = bn_relu(h, g1, be1)

    # fc2 (bias dropped) + bn2 + relu
    h = jnp.dot(h.astype(jnp.bfloat16), w2, preferred_element_type=jnp.float32)
    h = bn_relu(h, g2, be2)

    # fc3, padded to 128 output lanes; b3 folded here.
    o_ref[...] = jnp.dot(h.astype(jnp.bfloat16), w3,
                         preferred_element_type=jnp.float32) + b3


def prepare_params(params):
    """One-time conversion/packing of parameters (hoisted out of the call path)."""
    (w1, b1, g1, be1, w2, b2, g2, be2, w3, b3) = params
    del b1, b2  # mathematically redundant before training-mode BatchNorm
    n_out = w3.shape[1]

    # bf16 storage/DMA for the large operands; fp32 accumulation on the MXU.
    w1_b = w1.astype(jnp.bfloat16)                                   # (784, 128)

    # Concatenate w2 with 128-padded w3 -> single (128, 256) bf16 operand.
    w3_pad = jnp.zeros((w3.shape[0], OUT_PAD), jnp.float32).at[:, :n_out].set(w3)
    w23_b = jnp.concatenate([w2, w3_pad], axis=1).astype(jnp.bfloat16)  # (128, 256)

    # Pack all small per-feature vectors into one (8, 128) fp32 tile.
    zero_row = jnp.zeros((OUT_PAD,), jnp.float32)
    b3_pad = zero_row.at[:n_out].set(b3.reshape(-1))
    vecs = jnp.stack(
        [g1.reshape(-1), be1.reshape(-1),
         g2.reshape(-1), be2.reshape(-1),
         b3_pad, zero_row, zero_row, zero_row], axis=0)

    # Materialize now so per-call work is zero.
    return (jax.block_until_ready(w1_b),
            jax.block_until_ready(w23_b),
            jax.block_until_ready(vecs),
            n_out)


def network_a_forward_padded(x, prepared):
    """Returns lane-dense padded logits (N, 128); columns >= n_out are garbage+pad."""
    w1_b, w23_b, vecs, _ = prepared
    N = x.shape[0]

    vmem = pl.BlockSpec(memory_space=pltpu.MemorySpace.VMEM)

    flops = 2 * N * (x.shape[1] * HID + HID * HID + HID * OUT_PAD)
    bytes_accessed = (4 * x.size + 2 * (w1_b.size + w23_b.size)
                      + 4 * vecs.size + 4 * N * OUT_PAD)

    return pl.pallas_call(
        network_a_kernel,
        out_shape=jax.ShapeDtypeStruct((N, OUT_PAD), jnp.float32),
        in_specs=[vmem, vmem, vmem, vmem],
        out_specs=vmem,
        cost_estimate=pl.CostEstimate(flops=flops,
                                      transcendentals=2 * HID,
                                      bytes_accessed=bytes_accessed),
    )(x, w1_b, w23_b, vecs)


def network_a_forward(x, prepared):
    """Original module semantics: (N, 10) logits."""
    out_pad = network_a_forward_padded(x, prepared)
    return out_pad[:, :prepared[3]]


def reference_forward(x, params):
    """Pure fp32 JAX reference matching PyTorch training-mode semantics."""
    (w1, b1, g1, be1, w2, b2, g2, be2, w3, b3) = params

    def bn(h, g, be):
        mu = jnp.mean(h, axis=0, keepdims=True)
        var = jnp.mean((h - mu) ** 2, axis=0, keepdims=True)
        return (h - mu) / jnp.sqrt(var + EPS) * g + be

    h = jax.nn.relu(bn(x @ w1 + b1, g1, be1))
    h = jax.nn.relu(bn(h @ w2 + b2, g2, be2))
    return h @ w3 + b3


def init_params(key):
    ks = jax.random.split(key, 6)

    # PyTorch-style uniform(-1/sqrt(fan_in), 1/sqrt(fan_in)) init, deterministic.
    def lin(kw, kb, fan_in, fan_out):
        bound = 1.0 / jnp.sqrt(fan_in)
        w = jax.random.uniform(kw, (fan_in, fan_out), jnp.float32, -bound, bound)
        b = jax.random.uniform(kb, (1, fan_out), jnp.float32, -bound, bound)
        return w, b

    w1, b1 = lin(ks[0], ks[1], 784, 128)
    w2, b2 = lin(ks[2], ks[3], 128, 128)
    w3, b3 = lin(ks[4], ks[5], 128, 10)
    # BatchNorm affine params: gamma = 1, beta = 0 (PyTorch default init).
    g1, be1 = jnp.ones((1, 128), jnp.float32), jnp.zeros((1, 128), jnp.float32)
    g2, be2 = jnp.ones((1, 128), jnp.float32), jnp.zeros((1, 128), jnp.float32)
    return (w1, b1, g1, be1, w2, b2, g2, be2, w3, b3)


if __name__ == "__main__":
    key = jax.random.PRNGKey(0)
    k_x, k_p = jax.random.split(key)

    N = 32  # batch size (BatchNorm training-mode needs N > 1)
    x = jax.random.normal(k_x, (N, 784), jnp.float32)
    params = init_params(k_p)

    # One-time parameter conversion/packing (not on the per-call path).
    prepared = prepare_params(params)

    out = network_a_forward(x, prepared)
    out = jax.block_until_ready(out)

    ref = reference_forward(x, params)
    assert out.shape == (N, 10)
    # bf16 matmuls + single-pass variance -> looser tolerance than pure fp32.
    assert jnp.allclose(out, ref, atol=3e-2, rtol=3e-2), "mismatch vs JAX reference"

    print("KERNEL_OK")
</pallas_src>

<mosaic_0001>
module attributes {stable_mosaic.version = 11 : i64} {
  func.func @network_a_kernel(%arg0: memref<32x784xf32, #tpu.memory_space<vmem>>, %arg1: memref<784x128xbf16, #tpu.memory_space<vmem>>, %arg2: memref<128x256xbf16, #tpu.memory_space<vmem>>, %arg3: memref<8x128xf32, #tpu.memory_space<vmem>>, %arg4: memref<32x128xf32, #tpu.memory_space<vmem>>) attributes {dimension_semantics = [], scalar_prefetch = 0 : i64, scratch_operands = 0 : i64, tpu.core_type = #tpu.core_type<tc>} {
    %c0 = arith.constant 0 : index
    %c0_0 = arith.constant 0 : index
    %0 = vector.load %arg3[%c0, %c0_0] : memref<8x128xf32, #tpu.memory_space<vmem>>, vector<8x128xf32>
    %1 = vector.extract_strided_slice %0 {offsets = [0, 0], sizes = [1, 128], strides = [1, 1]} : vector<8x128xf32> to vector<1x128xf32>
    %2 = vector.extract_strided_slice %0 {offsets = [1, 0], sizes = [1, 128], strides = [1, 1]} : vector<8x128xf32> to vector<1x128xf32>
    %3 = vector.extract_strided_slice %0 {offsets = [2, 0], sizes = [1, 128], strides = [1, 1]} : vector<8x128xf32> to vector<1x128xf32>
    %4 = vector.extract_strided_slice %0 {offsets = [3, 0], sizes = [1, 128], strides = [1, 1]} : vector<8x128xf32> to vector<1x128xf32>
    %5 = vector.extract_strided_slice %0 {offsets = [4, 0], sizes = [1, 128], strides = [1, 1]} : vector<8x128xf32> to vector<1x128xf32>
    %c0_1 = arith.constant 0 : index
    %c0_2 = arith.constant 0 : index
    %6 = vector.load %arg2[%c0_1, %c0_2] : memref<128x256xbf16, #tpu.memory_space<vmem>>, vector<128x256xbf16>
    %7 = vector.extract_strided_slice %6 {offsets = [0, 0], sizes = [128, 128], strides = [1, 1]} : vector<128x256xbf16> to vector<128x128xbf16>
    %8 = vector.extract_strided_slice %6 {offsets = [0, 128], sizes = [128, 128], strides = [1, 1]} : vector<128x256xbf16> to vector<128x128xbf16>
    %c0_3 = arith.constant 0 : index
    %c0_4 = arith.constant 0 : index
    %9 = vector.load %arg0[%c0_3, %c0_4] : memref<32x784xf32, #tpu.memory_space<vmem>>, vector<32x784xf32>
    %10 = arith.truncf %9 : vector<32x784xf32> to vector<32x784xbf16>
    %c0_5 = arith.constant 0 : index
    %c0_6 = arith.constant 0 : index
    %11 = vector.load %arg1[%c0_5, %c0_6] : memref<784x128xbf16, #tpu.memory_space<vmem>>, vector<784x128xbf16>
    %cst = arith.constant dense<0.000000e+00> : vector<32x128xf32>
    %12 = tpu.matmul %10, %11, %cst {dimension_numbers = #tpu.dot_dimension_numbers<[1], [0], [0], [1], [0, 0, 1, 1], [], []>} : vector<32x784xbf16>, vector<784x128xbf16>, vector<32x128xf32> -> vector<32x128xf32>
    %cst_7 = arith.constant dense<0.000000e+00> : vector<128xf32>
    %13 = vector.multi_reduction <add>, %12, %cst_7 [0] : vector<32x128xf32> to vector<128xf32>
    %14 = vector.shape_cast %13 : vector<128xf32> to vector<1x128xf32>
    %15 = arith.mulf %12, %12 : vector<32x128xf32>
    %cst_8 = arith.constant dense<0.000000e+00> : vector<128xf32>
    %16 = vector.multi_reduction <add>, %15, %cst_8 [0] : vector<32x128xf32> to vector<128xf32>
    %17 = vector.shape_cast %16 : vector<128xf32> to vector<1x128xf32>
    %cst_9 = arith.constant 3.125000e-02 : f32
    %18 = vector.broadcast %cst_9 : f32 to vector<1x128xf32>
    %19 = arith.mulf %14, %18 : vector<1x128xf32>
    %cst_10 = arith.constant 3.125000e-02 : f32
    %20 = vector.broadcast %cst_10 : f32 to vector<1x128xf32>
    %21 = arith.mulf %17, %20 : vector<1x128xf32>
    %22 = arith.mulf %19, %19 : vector<1x128xf32>
    %23 = arith.subf %21, %22 : vector<1x128xf32>
    %24 = vector.broadcast %19 : vector<1x128xf32> to vector<32x128xf32>
    %25 = arith.subf %12, %24 : vector<32x128xf32>
    %cst_11 = arith.constant 9.99999974E-6 : f32
    %26 = vector.broadcast %cst_11 : f32 to vector<1x128xf32>
    %27 = arith.addf %23, %26 : vector<1x128xf32>
    %28 = math.rsqrt %27 : vector<1x128xf32>
    %29 = arith.mulf %28, %1 : vector<1x128xf32>
    %30 = vector.broadcast %29 : vector<1x128xf32> to vector<32x128xf32>
    %31 = arith.mulf %25, %30 : vector<32x128xf32>
    %32 = vector.broadcast %2 : vector<1x128xf32> to vector<32x128xf32>
    %33 = arith.addf %31, %32 : vector<32x128xf32>
    %cst_12 = arith.constant 0.000000e+00 : f32
    %34 = vector.broadcast %cst_12 : f32 to vector<32x128xf32>
    %35 = arith.maximumf %33, %34 : vector<32x128xf32>
    %36 = arith.truncf %35 : vector<32x128xf32> to vector<32x128xbf16>
    %cst_13 = arith.constant dense<0.000000e+00> : vector<32x128xf32>
    %37 = tpu.matmul %36, %7, %cst_13 {dimension_numbers = #tpu.dot_dimension_numbers<[1], [0], [0], [1], [0, 0, 1, 1], [], []>} : vector<32x128xbf16>, vector<128x128xbf16>, vector<32x128xf32> -> vector<32x128xf32>
    %cst_14 = arith.constant dense<0.000000e+00> : vector<128xf32>
    %38 = vector.multi_reduction <add>, %37, %cst_14 [0] : vector<32x128xf32> to vector<128xf32>
    %39 = vector.shape_cast %38 : vector<128xf32> to vector<1x128xf32>
    %40 = arith.mulf %37, %37 : vector<32x128xf32>
    %cst_15 = arith.constant dense<0.000000e+00> : vector<128xf32>
    %41 = vector.multi_reduction <add>, %40, %cst_15 [0] : vector<32x128xf32> to vector<128xf32>
    %42 = vector.shape_cast %41 : vector<128xf32> to vector<1x128xf32>
    %cst_16 = arith.constant 3.125000e-02 : f32
    %43 = vector.broadcast %cst_16 : f32 to vector<1x128xf32>
    %44 = arith.mulf %39, %43 : vector<1x128xf32>
    %cst_17 = arith.constant 3.125000e-02 : f32
    %45 = vector.broadcast %cst_17 : f32 to vector<1x128xf32>
    %46 = arith.mulf %42, %45 : vector<1x128xf32>
    %47 = arith.mulf %44, %44 : vector<1x128xf32>
    %48 = arith.subf %46, %47 : vector<1x128xf32>
    %49 = vector.broadcast %44 : vector<1x128xf32> to vector<32x128xf32>
    %50 = arith.subf %37, %49 : vector<32x128xf32>
    %cst_18 = arith.constant 9.99999974E-6 : f32
    %51 = vector.broadcast %cst_18 : f32 to vector<1x128xf32>
    %52 = arith.addf %48, %51 : vector<1x128xf32>
    %53 = math.rsqrt %52 : vector<1x128xf32>
    %54 = arith.mulf %53, %3 : vector<1x128xf32>
    %55 = vector.broadcast %54 : vector<1x128xf32> to vector<32x128xf32>
    %56 = arith.mulf %50, %55 : vector<32x128xf32>
    %57 = vector.broadcast %4 : vector<1x128xf32> to vector<32x128xf32>
    %58 = arith.addf %56, %57 : vector<32x128xf32>
    %cst_19 = arith.constant 0.000000e+00 : f32
    %59 = vector.broadcast %cst_19 : f32 to vector<32x128xf32>
    %60 = arith.maximumf %58, %59 : vector<32x128xf32>
    %61 = arith.truncf %60 : vector<32x128xf32> to vector<32x128xbf16>
    %cst_20 = arith.constant dense<0.000000e+00> : vector<32x128xf32>
    %62 = tpu.matmul %61, %8, %cst_20 {dimension_numbers = #tpu.dot_dimension_numbers<[1], [0], [0], [1], [0, 0, 1, 1], [], []>} : vector<32x128xbf16>, vector<128x128xbf16>, vector<32x128xf32> -> vector<32x128xf32>
    %63 = vector.broadcast %5 : vector<1x128xf32> to vector<32x128xf32>
    %64 = arith.addf %62, %63 : vector<32x128xf32>
    %c0_21 = arith.constant 0 : index
    %c0_22 = arith.constant 0 : index
    %65 = vector.load %arg4[%c0_21, %c0_22] : memref<32x128xf32, #tpu.memory_space<vmem>>, vector<32x128xf32>
    tpu.vector_store %arg4[%c0_21, %c0_22], %64 {strides = array<i32>} : memref<32x128xf32, #tpu.memory_space<vmem>>, vector<32x128xf32>,
    return
  }
}

</mosaic_0001>

<bundles_post_ra>
// kernel: tpu_custom_call.1
= control target key start
LH: loop header
LB: loop body
LE: loop exit
PB: predicated region body
PF: predicated region fallthrough
CT: control target
= control target key end

     0   :  { %9 = vsyncpa [#allocation3], 0  ;;  %s1528_s0 = inlined_call_operand.hbm [shape: f32[32,784], index: 0, kind: input, shape index: {}]   ;;  %s1529_s1 = inlined_call_operand.hbm [shape: bf16[784,128], index: 1, kind: input, shape index: {}]   ;;  %s1530_s2 = inlined_call_operand.hbm [shape: bf16[128,256], index: 2, kind: input, shape index: {}]   ;;  %s1531_s3 = inlined_call_operand.hbm [shape: f32[8,128], index: 3, kind: input, shape index: {}]   ;;  %s1532_s4 = inlined_call_operand.hbm [shape: f32[32,128], index: 4, kind: output, shape index: {}]  }
   0x1   :  { %10 = vsyncpa [#allocation6], 0 }
   0x2   :  { %11 = vsyncpa [#allocation9], 0 }
   0x3   :  { %12 = vsyncpa [#allocation4], 0  ;;  %s1457_s15 = smov [#allocation5]  }
   0x4   :  { %s30_s16 = sshll.u32 %s1457_s15, 4  ;;  %s31_s16 = int_to_ptr.vmem [resolvable:$true] %s30_s16 }
   0x5   :  { %s1357_s17 = scalar_lea.vmem %s31_s16, 6272  ;;  %p1362_p1 = scmp.lt.s32.totalorder %s31_s16, %s31_s16 }
   0x6   :  { %p1358_p0 = scmp.ne.s32.totalorder %s31_s16, %s1357_s17  ;;  %p1363_p2 = scmp.lt.s32.totalorder %s1357_s17, %s1357_s17 }
   0x8   :  { %p1364_p3 = por %p1363_p2, %p1362_p1 }
   0xa   :  { %p1365_p4 = pnand %p1364_p3, %p1358_p0 }
   0xc   :  { %1368 = shalt.err (!%p1365_p4)
}
   0xd   :  { %s1458_s18 = smov 64   ;;  %s1459_s19 = smov 4  }
   0xe   :  { %36 = dma.hbm_to_vmem [thread:$0]  %s1529_s1, 6272, %s31_s16, [#allocation6], %s1458_s18, %s1458_s18, %s1459_s19  }
   0xf   :  { %s1460_s22 = smov [#allocation2]  }
  0x10   :  { %s18_s23 = sshll.u32 %s1460_s22, 4  ;;  %s19_s23 = int_to_ptr.vmem [resolvable:$true] %s18_s23 }
  0x11   :  { %s1377_s24 = scalar_lea.vmem %s19_s23, 3584  ;;  %p1382_p6 = scmp.lt.s32.totalorder %s19_s23, %s19_s23 }
  0x12   :  { %p1378_p5 = scmp.ne.s32.totalorder %s19_s23, %s1377_s24  ;;  %p1383_p7 = scmp.lt.s32.totalorder %s1377_s24, %s1377_s24 }
  0x14   :  { %p1384_p8 = por %p1383_p7, %p1382_p6 }
  0x16   :  { %p1385_p9 = pnand %p1384_p8, %p1378_p5 }
  0x18   :  { %1388 = shalt.err (!%p1385_p9)
}
  0x19   :  { %s1461_s25 = smov 896   ;;  %s1462_s26 = smov 56  }
  0x1a   :  { %24 = dma.hbm_to_vmem [thread:$0]  %s1528_s0, 3584, %s19_s23, [#allocation3], %s1461_s25, %s1461_s25, %s1462_s26  }
  0x1b   :  { %s1463_s29 = smov [#allocation7]  }
  0x1c   :  { %s42_s30 = sshll.u32 %s1463_s29, 4  ;;  %s43_s30 = int_to_ptr.vmem [resolvable:$true] %s42_s30 }
  0x1d   :  { %s1397_s1 = scalar_lea.vmem %s43_s30, 2048  ;;  %p1402_p11 = scmp.lt.s32.totalorder %s43_s30, %s43_s30 }
  0x1e   :  { %p1398_p10 = scmp.ne.s32.totalorder %s43_s30, %s1397_s1  ;;  %p1403_p12 = scmp.lt.s32.totalorder %s1397_s1, %s1397_s1 }
  0x20   :  { %p1404_p13 = por %p1403_p12, %p1402_p11 }
  0x22   :  { %p1405_p0 = pnand %p1404_p13, %p1398_p10 }
  0x24   :  { %1408 = shalt.err (!%p1405_p0)
}
  0x25   :  { %s1464_s5 = smov 128   ;;  %s1465_s6 = smov 8  }
  0x26   :  { %48 = dma.hbm_to_vmem [thread:$0]  %s1530_s2, 2048, %s43_s30, [#allocation6], %s1464_s5, %s1464_s5, %s1465_s6  }
  0x27   :  { %s1466_s0 = smov [#allocation8]  }
  0x28   :  { %s55_s9 = sshll.u32 %s1466_s0, 4  ;;  %s56_s9 = int_to_ptr.vmem [resolvable:$true] %s55_s9 }
  0x29   :  { %s1417_s10 = scalar_lea.vmem %s56_s9, 128  ;;  %p1422_p2 = scmp.lt.s32.totalorder %s56_s9, %s56_s9 }
  0x2a   :  { %p1418_p1 = scmp.ne.s32.totalorder %s56_s9, %s1417_s10  ;;  %p1423_p3 = scmp.lt.s32.totalorder %s1417_s10, %s1417_s10 }
  0x2c   :  { %p1424_p4 = por %p1423_p3, %p1422_p2 }
  0x2e   :  { %p1425_p5 = pnand %p1424_p4, %p1418_p1 }
  0x30   :  { %1428 = shalt.err (!%p1425_p5)
}
  0x31   :  { %58 = dma.hbm_to_vmem [thread:$0]  %s1531_s3, 128, %s56_s9, [#allocation9]  }
  0x32   :  { %1449 = dma.done.wait [#allocation3], 3584  }
  0x33   :  { %1450 = vsyncadd [#allocation3], 4294963712 }
  0x34   :  { %1451 = dma.done.wait [#allocation6], 8320  }
  0x35   :  { %1452 = vsyncadd [#allocation6], 4294958976 }
  0x36   :  { %1453 = dma.done.wait [#allocation9], 128  }
  0x37   :  { %1454 = vsyncadd [#allocation9], 4294967168  ;;  %v1272_v0 = vld [vmem:[#allocation5 + $0x78] sm:$0xff]   ;;  %v1276_v4 = vld [vmem:[#allocation5 + $0x70] sm:$0xff]   ;;  %vm523_vm0 = vcmask 130048   ;;  %s1467_s2 = smov [#allocation10]  }
  0x38   :  { %v1273_v1 = vld [vmem:[#allocation5 + $0xf8] sm:$0xff]   ;;  %1108 = vmatprep.subr.bf16.mxu0 %v1272_v0  ;;  %v1277_v5 = vld [vmem:[#allocation5 + $0xf0] sm:$0xff]   ;;  %v1280_v8 = vld [vmem:[#allocation5 + $0x68] sm:$0xff]   ;;  %s1027_s3 = sshll.u32 %s1467_s2, 4  ;;  %s1028_s3 = int_to_ptr.vmem [resolvable:$true] %s1027_s3 }
  0x39   :  { %v1274_v2 = vld [vmem:[#allocation5 + $0x38] sm:$0xff]   ;;  %1136 = vmatprep.subr.bf16.mxu1 %v1273_v1  ;;  %v1278_v6 = vld [vmem:[#allocation5 + $0x30] sm:$0xff]   ;;  %v1281_v9 = vld [vmem:[#allocation5 + $0xe8] sm:$0xff]   ;;  %s1429_s13 = scalar_lea.vmem %s1028_s3, 512  ;;  %p1434_p7 = scmp.lt.s32.totalorder %s1028_s3, %s1028_s3 }
  0x3a   :  { %v1275_v3 = vld [vmem:[#allocation5 + $0xb8] sm:$0xff]   ;;  %1109 = vmatpush3.bf16.msra.mxu0 %v1274_v2  ;;  %v1279_v7 = vld [vmem:[#allocation5 + $0xb0] sm:$0xff]   ;;  %v1282_v10 = vld [vmem:[#allocation5 + $0x28] sm:$0xff]   ;;  %p1430_p6 = scmp.ne.s32.totalorder %s1028_s3, %s1429_s13  ;;  %p1435_p8 = scmp.lt.s32.totalorder %s1429_s13, %s1429_s13 }
  0x3b   :  { %1137 = vmatpush3.bf16.msra.mxu1 %v1275_v3  ;;  %1110 = vmatprep.subr.bf16.mxu0 %v1276_v4  ;;  %v1283_v11 = vld [vmem:[#allocation5 + $0xa8] sm:$0xff]   ;;  %v1284_v12 = vld [vmem:[#allocation5 + $0x60] sm:$0xff]   ;;  %v1288_v16 = vld [vmem:[#allocation5 + $0x58] sm:$0xff]  }
  0x3c   :  { %1138 = vmatprep.subr.bf16.mxu1 %v1277_v5  ;;  %v1285_v13 = vld [vmem:[#allocation5 + $0xe0] sm:$0xff]   ;;  %v1289_v17 = vld [vmem:[#allocation5 + $0xd8] sm:$0xff]   ;;  %v1292_v20 = vld [vmem:[#allocation5 + $0x50] sm:$0xff]   ;;  %p1436_p9 = por %p1435_p8, %p1434_p7 }
  0x3d   :  { %v1286_v14 = vld [vmem:[#allocation5 + $0x20] sm:$0xff]   ;;  %v1290_v18 = vld [vmem:[#allocation5 + $0x18] sm:$0xff]   ;;  %v1293_v21 = vld [vmem:[#allocation5 + $0xd0] sm:$0xff]  }
  0x3e   :  { %1111 = vmatpush3.bf16.msra.mxu0 %v1278_v6  ;;  %v1287_v15 = vld [vmem:[#allocation5 + $0xa0] sm:$0xff]   ;;  %v1291_v19 = vld [vmem:[#allocation5 + $0x98] sm:$0xff]   ;;  %v1294_v22 = vld [vmem:[#allocation5 + $0x10] sm:$0xff]   ;;  %p1437_p10 = pnand %p1436_p9, %p1430_p6 }
  0x3f   :  { %1139 = vmatpush3.bf16.msra.mxu1 %v1279_v7  ;;  %1112 = vmatprep.subr.bf16.mxu0 %v1280_v8  ;;  %v1295_v23 = vld [vmem:[#allocation5 + $0x90] sm:$0xff]   ;;  %v1296_v24 = vld [vmem:[#allocation5 + $0x48] sm:$0xff]   ;;  %v1300_v28 = vld [vmem:[#allocation5 + $0x40] sm:$0xff]  }
  0x40   :  { %1140 = vmatprep.subr.bf16.mxu1 %v1281_v9  ;;  %v1297_v25 = vld [vmem:[#allocation5 + $0xc8] sm:$0xff]   ;;  %v1301_v29 = vld [vmem:[#allocation5 + $0xc0] sm:$0xff]   ;;  %v92_v34 = vld [vmem:[#allocation2 + $0x18] sm:$0xff] }
  0x41   :  { %v1298_v26 = vld [vmem:[#allocation5 + $0x8] sm:$0xff]   ;;  %v1302_v30 = vld [vmem:[#allocation5] sm:$0xff]   ;;  %v99_v36 = vld [vmem:[#allocation2 + $0x50] sm:$0xff] }
  0x42   :  { %1113 = vmatpush3.bf16.msra.mxu0 %v1282_v10  ;;  %v1299_v27 = vld [vmem:[#allocation5 + $0x88] sm:$0xff]   ;;  %v1303_v31 = vld [vmem:[#allocation5 + $0x80] sm:$0xff]   ;;  %v96_v38 = vld [vmem:[#allocation2 + $0x38] sm:$0xff]  ;;  %v120_v39 = vpack.c.bf16 %v99_v36, %v92_v34 }
  0x43   :  { %1141 = vmatpush3.bf16.msra.mxu1 %v1283_v11  ;;  %1114 = vmatprep.subr.bf16.mxu0 %v1284_v12  ;;  %v90_v32 = vld [vmem:[#allocation2 + $0x8] sm:$0xff]  ;;  %v97_v33 = vld [vmem:[#allocation2 + $0x40] sm:$0xff]  ;;  %v91_v41 = vld [vmem:[#allocation2 + $0x10] sm:$0xff] }
  0x44   :  { %1142 = vmatprep.subr.bf16.mxu1 %v1285_v13  ;;  %v118_v35 = vpack.c.bf16 %v97_v33, %v90_v32  ;;  %v89_v37 = vld [vmem:[#allocation2] sm:$0xff]  ;;  %v98_v42 = vld [vmem:[#allocation2 + $0x48] sm:$0xff]  ;;  %v1304_v44 = vld [vmem:[#allocation5 + $0x178] sm:$0xff]   ;;  %611 = vmatprep.mubr.bf16.mxu1 %v120_v39 }
  0x45   :  { %v117_v40 = vpack.c.bf16 %v96_v38, %v89_v37  ;;  %v119_v43 = vpack.c.bf16 %v98_v42, %v91_v41  ;;  %v1305_v45 = vld [vmem:[#allocation5 + $0x138] sm:$0xff]   ;;  %v1306_v46 = vld [vmem:[#allocation5 + $0x170] sm:$0xff]   ;;  %v1308_v48 = vld [vmem:[#allocation5 + $0x168] sm:$0xff]  }
  0x46   :  { %1115 = vmatpush3.bf16.msra.mxu0 %v1286_v14  ;;  %562 = vmatprep.mubr.bf16.mxu0 %v118_v35  ;;  %v1307_v47 = vld [vmem:[#allocation5 + $0x130] sm:$0xff]   ;;  %v1309_v49 = vld [vmem:[#allocation5 + $0x128] sm:$0xff]   ;;  %v1310_v50 = vld [vmem:[#allocation5 + $0x160] sm:$0xff]  }
  0x47   :  { %1143 = vmatpush3.bf16.msra.mxu1 %v1287_v15  ;;  %1116 = vmatprep.subr.bf16.mxu0 %v1288_v16  ;;  %v104_v51 = vld [vmem:[#allocation2 + $0x78] sm:$0xff]  ;;  %v1311_v52 = vld [vmem:[#allocation5 + $0x120] sm:$0xff]   ;;  %v111_v53 = vld [vmem:[#allocation2 + $0xb0] sm:$0xff] }
  0x48   :  { %1144 = vmatprep.subr.bf16.mxu1 %v1289_v17  ;;  %v106_v54 = vld [vmem:[#allocation2 + $0x88] sm:$0xff]  ;;  %v113_v55 = vld [vmem:[#allocation2 + $0xc0] sm:$0xff]  ;;  %v1312_v56 = vld [vmem:[#allocation5 + $0x158] sm:$0xff]   ;;  %v125_v57 = vpack.c.bf16 %v111_v53, %v104_v51 }
  0x49   :  { %v127_v58 = vpack.c.bf16 %v113_v55, %v106_v54  ;;  %v103_v59 = vld [vmem:[#allocation2 + $0x70] sm:$0xff]  ;;  %v110_v60 = vld [vmem:[#allocation2 + $0xa8] sm:$0xff]  ;;  %v105_v61 = vld [vmem:[#allocation2 + $0x80] sm:$0xff] }
  0x4a   :  { %1117 = vmatpush3.bf16.msra.mxu0 %v1290_v18  ;;  %v124_v62 = vpack.c.bf16 %v110_v60, %v103_v59  ;;  %v112_v63 = vld [vmem:[#allocation2 + $0xb8] sm:$0xff]  ;;  %v1316_v2 = vld [vmem:[#allocation5 + $0x180] sm:$0xff]   ;;  %v1314_v3 = vld [vmem:[#allocation5 + $0x150] sm:$0xff]  }
  0x4b   :  { %1145 = vmatpush3.bf16.msra.mxu1 %v1291_v19  ;;  %1118 = vmatprep.subr.bf16.mxu0 %v1292_v20  ;;  %v126_v0 = vpack.c.bf16 %v112_v63, %v105_v61  ;;  %v1313_v1 = vld [vmem:[#allocation5 + $0x118] sm:$0xff]   ;;  %v1315_v4 = vld [vmem:[#allocation5 + $0x110] sm:$0xff]   ;;  %v94_v5 = vld [vmem:[#allocation2 + $0x28] sm:$0xff] }
  0x4c   :  { %1146 = vmatprep.subr.bf16.mxu1 %v1293_v21  ;;  %v101_v6 = vld [vmem:[#allocation2 + $0x60] sm:$0xff]  ;;  %v1317_v7 = vld [vmem:[#allocation5 + $0x148] sm:$0xff]   ;;  %v95_v9 = vld [vmem:[#allocation2 + $0x30] sm:$0xff] }
  0x4d   :  { %v122_v8 = vpack.c.bf16 %v101_v6, %v94_v5  ;;  %v102_v10 = vld [vmem:[#allocation2 + $0x68] sm:$0xff]  ;;  %v109_v11 = vld [vmem:[#allocation2 + $0xa0] sm:$0xff]  ;;  %v116_v12 = vld [vmem:[#allocation2 + $0xd8] sm:$0xff] }
  0x4e   :  { %1119 = vmatpush3.bf16.msra.mxu0 %v1294_v22  ;;  %v1318_v13 = vld [vmem:[#allocation5 + $0x108] sm:$0xff]   ;;  %v123_v14 = vpack.c.bf16 %v102_v10, %v95_v9  ;;  %v130_v15 = vpack.c.bf16 %v116_v12, %v109_v11  ;;  %v1319_v16 = vld [vmem:[#allocation5 + $0x140] sm:$0xff]   ;;  %v100_v19 = vld [vmem:[#allocation2 + $0x58] sm:$0xff] }
  0x4f   :  { %1147 = vmatpush3.bf16.msra.mxu1 %v1295_v23  ;;  %1120 = vmatprep.subr.bf16.mxu0 %v1296_v24  ;;  %v1320_v17 = vld [vmem:[#allocation5 + $0x100] sm:$0xff]   ;;  %v108_v20 = vld [vmem:[#allocation2 + $0x98] sm:$0xff]  ;;  %v115_v21 = vld [vmem:[#allocation2 + $0xd0] sm:$0xff] }
  0x50   :  { %1148 = vmatprep.subr.bf16.mxu1 %v1297_v25  ;;  %v93_v18 = vld [vmem:[#allocation2 + $0x20] sm:$0xff]  ;;  %v129_v23 = vpack.c.bf16 %v115_v21, %v108_v20  ;;  %v107_v24 = vld [vmem:[#allocation2 + $0x90] sm:$0xff]  ;;  %v114_v25 = vld [vmem:[#allocation2 + $0xc8] sm:$0xff] }
  0x51   :  { %v121_v22 = vpack.c.bf16 %v100_v19, %v93_v18  ;;  %v1331_v32 = vld [vmem:[#allocation7 + $0x20] ss:$8 sps:$4 sm:$0xff]   ;;  %v1333_v33 = vld [vmem:[#allocation7 + $0x10] ss:$8 sps:$4 sm:$0xff]  }
  0x52   :  { %1121 = vmatpush3.bf16.msra.mxu0 %v1298_v26  ;;  %v128_v26 = vpack.c.bf16 %v114_v25, %v107_v24  ;;  %v1335_v34 = vld [vmem:[#allocation7] ss:$8 sps:$4 sm:$0xff]  }
  0x53   :  { %1149 = vmatpush3.bf16.msra.mxu1 %v1299_v27  ;;  %1122 = vmatprep.subr.bf16.mxu0 %v1300_v28  ;;  %v1321_v27 = vld [vmem:[#allocation7 + $0x70] ss:$8 sps:$4 sm:$0xff]   ;;  %v1323_v28 = vld [vmem:[#allocation7 + $0x60] ss:$8 sps:$4 sm:$0xff]  }
  0x54   :  { %1150 = vmatprep.subr.bf16.mxu1 %v1301_v29  ;;  %v1325_v29 = vld [vmem:[#allocation7 + $0x50] ss:$8 sps:$4 sm:$0xff]  }
  0x56   :  { %1123 = vmatpush3.bf16.msra.mxu0 %v1302_v30  ;;  %v1327_v30 = vld [vmem:[#allocation7 + $0x40] ss:$8 sps:$4 sm:$0xff]  }
  0x57   :  { %1151 = vmatpush3.bf16.msra.mxu1 %v1303_v31  ;;  %1164 = vmatprep.subr.bf16.mxu0 %v1304_v44  ;;  %v1329_v31 = vld [vmem:[#allocation7 + $0x30] ss:$8 sps:$4 sm:$0xff]  }
  0x58   :  { %1215 = vmatprep.subr.bf16.mxu1 %v1316_v2 }
  0x59   :  { %563 = vmatmul.mubr.bf16.vlgmr.msra.gmra.mxu0 %v117_v40 }
  0x5a   :  { %612 = vmatmul.mubr.bf16.vlgmr.msra.gmra.mxu1 %v119_v43  ;;  %1165 = vmatpush3.bf16.msra.mxu0 %v1305_v45 }
  0x5b   :  { %1166 = vmatprep.subr.bf16.mxu0 %v1306_v46  ;;  %570 = vmatprep.mubr.bf16.mxu0 %v125_v57 }
  0x5c   :  { %619 = vmatprep.mubr.bf16.mxu1 %v127_v58  ;;  %1216 = vmatpush3.bf16.msra.mxu1 %v1316_v2 }
  0x5d   :  { %1221 = vmatprep.subr.bf16.mxu1 %v1321_v27 }
  0x5e   :  { %1167 = vmatpush3.bf16.msra.mxu0 %v1307_v47 }
  0x5f   :  { %1168 = vmatprep.subr.bf16.mxu0 %v1308_v48 }
  0x61   :  { %571 = vmatmul.mubr.bf16.gmra.mxu0 %v124_v62 }
  0x62   :  { %1169 = vmatpush3.bf16.msra.mxu0 %v1309_v49  ;;  %620 = vmatmul.mubr.bf16.gmra.mxu1 %v126_v0 }
  0x63   :  { %1170 = vmatprep.subr.bf16.mxu0 %v1310_v50  ;;  %660 = vmatprep.mubr.bf16.mxu0 %v122_v8 }
  0x64   :  { %1217 = vmatprep.mubr.msk.bf16.mxu1 %vm523_vm0, %v123_v14 }
  0x66   :  { %1171 = vmatpush3.bf16.msra.mxu0 %v1311_v52 }
  0x67   :  { %1172 = vmatprep.subr.bf16.mxu0 %v1312_v56 }
  0x6a   :  { %1173 = vmatpush3.bf16.msra.mxu0 %v1313_v1  ;;  %1218 = vmatmul.mubr.msk.bf16.vlgmr.msra.gmra.mxu1 %vm523_vm0, %v130_v15 }
  0x6b   :  { %1174 = vmatprep.subr.bf16.mxu0 %v1314_v3  ;;  %1222 = vmatpush3.bf16.msra.mxu1 %v1321_v27 }
  0x6c   :  { %1223 = vmatprep.subr.bf16.mxu1 %v1323_v28 }
  0x6e   :  { %1175 = vmatpush3.bf16.msra.mxu0 %v1315_v4 }
  0x6f   :  { %1176 = vmatprep.subr.bf16.mxu0 %v1317_v7  ;;  %1224 = vmatpush3.bf16.msra.mxu1 %v1323_v28 }
  0x70   :  { %1225 = vmatprep.subr.bf16.mxu1 %v1325_v29 }
  0x72   :  { %1177 = vmatpush3.bf16.msra.mxu0 %v1318_v13 }
  0x73   :  { %1178 = vmatprep.subr.bf16.mxu0 %v1319_v16  ;;  %1226 = vmatpush3.bf16.msra.mxu1 %v1325_v29 }
  0x74   :  { %1227 = vmatprep.subr.bf16.mxu1 %v1327_v30 }
  0x76   :  { %1179 = vmatpush3.bf16.msra.mxu0 %v1320_v17 }
  0x77   :  { %1228 = vmatpush3.bf16.msra.mxu1 %v1327_v30 }
  0x78   :  { %1229 = vmatprep.subr.bf16.mxu1 %v1329_v31 }
  0x79   :  { %661 = vmatmul.mubr.bf16.vlgmr.msra.gmra.mxu0 %v121_v22 }
  0x7a   :  { %668 = vmatprep.mubr.bf16.mxu0 %v129_v23 }
  0x7b   :  { %1230 = vmatpush3.bf16.msra.mxu1 %v1329_v31 }
  0x7c   :  { %1231 = vmatprep.subr.bf16.mxu1 %v1331_v32 }
  0x7f   :  { %1232 = vmatpush3.bf16.msra.mxu1 %v1331_v32 }
  0x80   :  { %1233 = vmatprep.subr.bf16.mxu1 %v1333_v33 }
  0x81   :  { %669 = vmatmul.mubr.bf16.gmra.mxu0 %v128_v26 }
  0x83   :  { %1234 = vmatpush3.bf16.msra.mxu1 %v1333_v33 }
  0x84   :  { %1235 = vmatprep.subr.bf16.mxu1 %v1335_v34 }
  0x87   :  { %1236 = vmatpush3.bf16.msra.mxu1 %v1335_v34 }
 0x119   :  { %v1124_v36 = vpop.f32.mrf.mxu0 }
 0x11a   :  { %v1152_v35 = vpop.f32.mrf.mxu1 }
 0x11b   :  { %v1125_v38 = vpop.f32.mrf.mxu0 }
 0x11c   :  { %v1153_v37 = vpop.f32.mrf.mxu1  ;;  %v1126_v55 = vadd.f32 %v1125_v38, %v1124_v36 }
 0x11d   :  { %v1127_v40 = vpop.f32.mrf.mxu0  ;;  %v1154_v56 = vadd.f32 %v1153_v37, %v1152_v35 }
 0x11e   :  { %v1155_v39 = vpop.f32.mrf.mxu1 }
 0x11f   :  { %v1128_v42 = vpop.f32.mrf.mxu0  ;;  %v614_v1 = vadd.f32 %v1154_v56, %v1126_v55 }
 0x120   :  { %v1156_v41 = vpop.f32.mrf.mxu1  ;;  %v1129_v57 = vadd.f32 %v1128_v42, %v1127_v40 }
 0x121   :  { %v1130_v44 = vpop.f32.mrf.mxu0  ;;  %v1157_v58 = vadd.f32 %v1156_v41, %v1155_v39 }
 0x122   :  { %v1158_v43 = vpop.f32.mrf.mxu1 }
 0x123   :  { %v1131_v46 = vpop.f32.mrf.mxu0  ;;  %v617_v2 = vadd.f32 %v1157_v58, %v1129_v57 }
 0x124   :  { %v1159_v45 = vpop.f32.mrf.mxu1  ;;  %v1132_v61 = vadd.f32 %v1131_v46, %v1130_v44 }
 0x125   :  { %v1133_v48 = vpop.f32.mrf.mxu0  ;;  %v1160_v62 = vadd.f32 %v1159_v45, %v1158_v43 }
 0x126   :  { %v1161_v47 = vpop.f32.mrf.mxu1 }
 0x127   :  { %v1134_v50 = vpop.f32.mrf.mxu0  ;;  %v622_v7 = vadd.f32 %v1160_v62, %v1132_v61 }
 0x128   :  { %v1162_v49 = vpop.f32.mrf.mxu1  ;;  %v1135_v10 = vadd.f32 %v1134_v50, %v1133_v48  ;;  %v759_v50 = vlaneseq }
 0x129   :  { %v1163_v11 = vadd.f32 %v1162_v49, %v1161_v47 }
 0x12a   :  { %v1219_v51 = vpop.f32.mrf.mxu1 }
 0x12b   :  { %v625_v18 = vadd.f32 %v1163_v11, %v1135_v10 }
 0x12c   :  { %v711_v54 = vpop.f32.mrf.mxu1 }
 0x12e   :  { %v1220_v0 = vpop.f32.mrf.mxu1 }
 0x130   :  { %v714_v8 = vpop.f32.mrf.mxu1 }
 0x139   :  { %v1180_v52 = vpop.f32.mrf.mxu0 }
 0x13b   :  { %v1181_v53 = vpop.f32.mrf.mxu0 }
 0x13c   :  { %v1182_v60 = vadd.f32 %v1181_v53, %v1180_v52  ;;  %v1510_v52 = vld [vmem:[#allocation8] sm:$0xff] }
 0x13d   :  { %v1183_v59 = vpop.f32.mrf.mxu0 }
 0x13e   :  { %v663_v5 = vadd.f32 %v1182_v60, %v614_v1 }
 0x13f   :  { %v1184_v63 = vpop.f32.mrf.mxu0 }
 0x140   :  { %v1185_v3 = vadd.f32 %v1184_v63, %v1183_v59  ;;  %v712_v15 = vadd.f32 %v711_v54, %v663_v5 }
 0x141   :  { %v1186_v4 = vpop.f32.mrf.mxu0 }
 0x142   :  { %v666_v6 = vadd.f32 %v1185_v3, %v617_v2  ;;  %v735_v22 = vmul.f32 %v712_v15, %v712_v15 }
 0x143   :  { %v1187_v9 = vpop.f32.mrf.mxu0 }
 0x144   :  { %v715_v12 = vadd.f32 %v714_v8, %v666_v6  ;;  %v1188_v13 = vadd.f32 %v1187_v9, %v1186_v4 }
 0x145   :  { %v1189_v14 = vpop.f32.mrf.mxu0 }
 0x146   :  { %v671_v16 = vadd.f32 %v1188_v13, %v622_v7  ;;  %v736_v19 = vmul.f32 %v715_v12, %v715_v12  ;;  %v726_v23 = vadd.f32 %v715_v12, %v712_v15 }
 0x147   :  { %v1190_v17 = vpop.f32.mrf.mxu0 }
 0x148   :  { %v720_v20 = vadd.f32 %v1219_v51, %v671_v16  ;;  %v1191_v21 = vadd.f32 %v1190_v17, %v1189_v14  ;;  %v739_v26 = vadd.f32 %v736_v19, %v735_v22  ;;  %v1508_v51 = vshrl.u32 %v759_v50, 7  ;;  %v1337_v14 = vld [vmem:[#allocation7 + $0x74] ss:$8 sps:$4 sm:$0xff]   ;;  %v1340_v16 = vld [vmem:[#allocation7 + $0x44] ss:$8 sps:$4 sm:$0xff]  }
 0x149   :  { %1241 = vmatprep.subr.bf16.mxu0 %v1337_v14  ;;  %v1341_v17 = vld [vmem:[#allocation7 + $0x34] ss:$8 sps:$4 sm:$0xff]  }
 0x14a   :  { %v737_v24 = vmul.f32 %v720_v20, %v720_v20  ;;  %v674_v25 = vadd.f32 %v1191_v21, %v625_v18  ;;  %v727_v27 = vadd.f32 %v726_v23, %v720_v20  ;;  %v769_v53 = vsub.s32 1, %v1508_v51  ;;  %1242 = vmatpush3.bf16.msra.mxu0 %v1337_v14  ;;  %v1342_v18 = vld [vmem:[#allocation7 + $0x24] ss:$8 sps:$4 sm:$0xff]   ;;  %v1343_v19 = vld [vmem:[#allocation7 + $0x14] ss:$8 sps:$4 sm:$0xff]  }
 0x14b   :  { %v761_v54 = vsub.s32 0, %v1508_v51 }
 0x14c   :  { %v723_v28 = vadd.f32 %v1220_v0, %v674_v25  ;;  %v740_v29 = vadd.f32 %v739_v26, %v737_v24  ;;  %v770_v58 = vrot.slane %v1510_v52, %v769_v53 }
 0x14e   :  { %v728_v30 = vadd.f32 %v727_v27, %v723_v28  ;;  %v738_v31 = vmul.f32 %v723_v28, %v723_v28 }
 0x150   :  { %v729_v32 = vrot.slane %v728_v30, 4  ;;  %v741_v33 = vadd.f32 %v740_v29, %v738_v31 }
 0x152   :  { %v730_v34 = vadd.f32 %v729_v32, %v728_v30  ;;  %v742_v35 = vrot.slane %v741_v33, 4 }
 0x154   :  { %v731_v36 = vrot.slane %v730_v34, 2  ;;  %v743_v37 = vadd.f32 %v742_v35, %v741_v33 }
 0x156   :  { %v732_v38 = vadd.f32 %v731_v36, %v730_v34  ;;  %v744_v39 = vrot.slane %v743_v37, 2 }
 0x158   :  { %v733_v40 = vrot.slane %v732_v38, 1  ;;  %v745_v41 = vadd.f32 %v744_v39, %v743_v37 }
 0x15a   :  { %v734_v42 = vadd.f32 %v733_v40, %v732_v38  ;;  %v746_v43 = vrot.slane %v745_v41, 1 }
 0x15c   :  { %v747_v44 = vadd.f32 %v746_v43, %v745_v41  ;;  %v748_v45 = vmul.f32 0.03125, %v734_v42 }
 0x15e   :  { %v749_v46 = vmul.f32 0.03125, %v747_v44  ;;  %v750_v47 = vmul.f32 %v748_v45, %v748_v45  ;;  %v755_v57 = vsub.f32 %v723_v28, %v748_v45  ;;  %v752_v60 = vsub.f32 %v712_v15, %v748_v45  ;;  %v1339_v15 = vld [vmem:[#allocation7 + $0x54] ss:$8 sps:$4 sm:$0xff]  }
 0x15f   :  { %v753_v61 = vsub.f32 %v715_v12, %v748_v45  ;;  %v754_v62 = vsub.f32 %v720_v20, %v748_v45  ;;  %v1338_v12 = vld [vmem:[#allocation7 + $0x64] ss:$8 sps:$4 sm:$0xff]  }
 0x160   :  { %v751_v48 = vsub.f32 %v749_v46, %v750_v47  ;;  %1243 = vmatprep.subr.bf16.mxu0 %v1338_v12  ;;  %v1344_v20 = vld [vmem:[#allocation7 + $0x4] ss:$8 sps:$4 sm:$0xff]  }
 0x161   :  { %1244 = vmatpush3.bf16.msra.mxu0 %v1338_v12  ;;  %v935_v12 = vsub.s32 4, %v1508_v51 }
 0x162   :  { %v756_v49 = vadd.f32 1e-05, %v751_v48  ;;  %1245 = vmatprep.subr.bf16.mxu0 %v1339_v15 }
 0x164   :  { %1345 = vrsqrt.f32 %v756_v49 }
 0x165   :  { %1246 = vmatpush3.bf16.msra.mxu0 %v1339_v15  ;;  %v936_v15 = vrot.slane %v1510_v52, %v935_v12 }
 0x166   :  { %1247 = vmatprep.subr.bf16.mxu0 %v1340_v16 }
 0x169   :  { %1248 = vmatpush3.bf16.msra.mxu0 %v1340_v16 }
 0x16a   :  { %1249 = vmatprep.subr.bf16.mxu0 %v1341_v17 }
 0x16d   :  { %1250 = vmatpush3.bf16.msra.mxu0 %v1341_v17 }
 0x16e   :  { %1251 = vmatprep.subr.bf16.mxu0 %v1342_v18 }
 0x171   :  { %v1346_v55 = vpop.eup %1345  ;;  %1252 = vmatpush3.bf16.msra.mxu0 %v1342_v18 }
 0x172   :  { %v758_v56 = vmul.f32 %v1346_v55, %v1510_v52  ;;  %1253 = vmatprep.subr.bf16.mxu0 %v1343_v19  ;;  %v913_v55 = vsub.s32 2, %v1508_v51 }
 0x174   :  { %v762_v59 = vrot.slane %v758_v56, %v761_v54  ;;  %v921_v54 = vsub.s32 3, %v1508_v51 }
 0x175   :  { %1254 = vmatpush3.bf16.msra.mxu0 %v1343_v19 }
 0x176   :  { %v766_v63 = vmul.f32 %v762_v59, %v755_v57  ;;  %v763_v0 = vmul.f32 %v762_v59, %v752_v60  ;;  %v764_v1 = vmul.f32 %v762_v59, %v753_v61  ;;  %v765_v2 = vmul.f32 %v762_v59, %v754_v62  ;;  %1255 = vmatprep.subr.bf16.mxu0 %v1344_v20 }
 0x177   :  { %v922_v59 = vrot.slane %v1510_v52, %v921_v54 }
 0x178   :  { %v771_v3 = vadd.f32 %v770_v58, %v763_v0  ;;  %v772_v4 = vadd.f32 %v770_v58, %v764_v1  ;;  %v773_v5 = vadd.f32 %v770_v58, %v765_v2  ;;  %v774_v6 = vadd.f32 %v770_v58, %v766_v63 }
 0x179   :  { %1256 = vmatpush3.bf16.msra.mxu0 %v1344_v20 }
 0x17a   :  { %v775_v7 = vmax.f32 %v771_v3, 0.0  ;;  %v776_v8 = vmax.f32 %v772_v4, 0.0  ;;  %v777_v9 = vmax.f32 %v773_v5, 0.0  ;;  %v778_v10 = vmax.f32 %v774_v6, 0.0 }
 0x17c   :  { %v779_v11 = vpack.c.bf16 %v776_v8, %v775_v7  ;;  %v780_v13 = vpack.c.bf16 %v778_v10, %v777_v9 }
 0x17e   :  { %1237 = vmatprep.mubr.bf16.mxu1 %v779_v11 }
 0x17f   :  { %1238 = vmatmul.mubr.bf16.vlgmr.msra.gmra.mxu1 %v780_v13 }
 0x23f   :  { %v1239_v21 = vpop.f32.mrf.mxu1 }
 0x240   :  { %v889_v28 = vmul.f32 %v1239_v21, %v1239_v21 }
 0x241   :  { %v863_v22 = vpop.f32.mrf.mxu1 }
 0x242   :  { %v887_v25 = vmul.f32 %v863_v22, %v863_v22 }
 0x243   :  { %v1240_v23 = vpop.f32.mrf.mxu1 }
 0x244   :  { %v890_v31 = vmul.f32 %v1240_v23, %v1240_v23 }
 0x245   :  { %v866_v24 = vpop.f32.mrf.mxu1 }
 0x246   :  { %v878_v26 = vadd.f32 %v866_v24, %v863_v22  ;;  %v888_v27 = vmul.f32 %v866_v24, %v866_v24 }
 0x248   :  { %v879_v29 = vadd.f32 %v1239_v21, %v878_v26  ;;  %v891_v30 = vadd.f32 %v888_v27, %v887_v25 }
 0x24a   :  { %v880_v32 = vadd.f32 %v1240_v23, %v879_v29  ;;  %v892_v33 = vadd.f32 %v891_v30, %v889_v28 }
 0x24c   :  { %v881_v34 = vrot.slane %v880_v32, 4  ;;  %v893_v35 = vadd.f32 %v892_v33, %v890_v31 }
 0x24e   :  { %v882_v36 = vadd.f32 %v881_v34, %v880_v32  ;;  %v894_v37 = vrot.slane %v893_v35, 4 }
 0x250   :  { %v883_v38 = vrot.slane %v882_v36, 2  ;;  %v895_v39 = vadd.f32 %v894_v37, %v893_v35 }
 0x252   :  { %v884_v40 = vadd.f32 %v883_v38, %v882_v36  ;;  %v896_v41 = vrot.slane %v895_v39, 2 }
 0x254   :  { %v885_v42 = vrot.slane %v884_v40, 1  ;;  %v897_v43 = vadd.f32 %v896_v41, %v895_v39 }
 0x256   :  { %v886_v44 = vadd.f32 %v885_v42, %v884_v40  ;;  %v898_v45 = vrot.slane %v897_v43, 1 }
 0x258   :  { %v899_v46 = vadd.f32 %v898_v45, %v897_v43  ;;  %v900_v47 = vmul.f32 0.03125, %v886_v44 }
 0x25a   :  { %v901_v48 = vmul.f32 0.03125, %v899_v46  ;;  %v902_v49 = vmul.f32 %v900_v47, %v900_v47  ;;  %v905_v58 = vsub.f32 %v866_v24, %v900_v47  ;;  %v904_v61 = vsub.f32 %v863_v22, %v900_v47 }
 0x25b   :  { %v906_v62 = vsub.f32 %v1239_v21, %v900_v47  ;;  %v907_v63 = vsub.f32 %v1240_v23, %v900_v47 }
 0x25c   :  { %v903_v50 = vsub.f32 %v901_v48, %v902_v49 }
 0x25e   :  { %v908_v53 = vadd.f32 1e-05, %v903_v50 }
 0x260   :  { %1347 = vrsqrt.f32 %v908_v53 }
 0x26d   :  { %v1348_v56 = vpop.eup %1347 }
 0x26e   :  { %v910_v57 = vmul.f32 %v1348_v56, %v1510_v52 }
 0x270   :  { %v914_v60 = vrot.slane %v910_v57, %v913_v55 }
 0x272   :  { %v916_v0 = vmul.f32 %v914_v60, %v905_v58  ;;  %v915_v1 = vmul.f32 %v914_v60, %v904_v61  ;;  %v917_v2 = vmul.f32 %v914_v60, %v906_v62  ;;  %v918_v3 = vmul.f32 %v914_v60, %v907_v63 }
 0x274   :  { %v924_v4 = vadd.f32 %v922_v59, %v916_v0  ;;  %v923_v5 = vadd.f32 %v922_v59, %v915_v1  ;;  %v925_v6 = vadd.f32 %v922_v59, %v917_v2  ;;  %v926_v7 = vadd.f32 %v922_v59, %v918_v3 }
 0x276   :  { %v927_v8 = vmax.f32 %v923_v5, 0.0  ;;  %v928_v9 = vmax.f32 %v924_v4, 0.0  ;;  %v929_v10 = vmax.f32 %v925_v6, 0.0  ;;  %v930_v11 = vmax.f32 %v926_v7, 0.0 }
 0x278   :  { %v931_v13 = vpack.c.bf16 %v928_v9, %v927_v8  ;;  %v932_v14 = vpack.c.bf16 %v930_v11, %v929_v10 }
 0x27a   :  { %1257 = vmatprep.mubr.bf16.mxu0 %v931_v13 }
 0x27b   :  { %1258 = vmatmul.mubr.bf16.vlgmr.msra.gmra.mxu0 %v932_v14 }
 0x33b   :  { %v1259_v16 = vpop.f32.mrf.mxu0 }
 0x33c   :  { %v1012_v17 = vadd.f32 %v1259_v16, %v936_v15 }
 0x33d   :  { %v1003_v18 = vpop.f32.mrf.mxu0 }
 0x33e   :  { %1020 = vst [vmem:[#allocation10 + $0x10] sm:$0xff] %v1012_v17  ;;  %v1004_v19 = vadd.f32 %v1003_v18, %v936_v15 }
 0x33f   :  { %v1260_v20 = vpop.f32.mrf.mxu0 }
 0x340   :  { %1018 = vst [vmem:[#allocation10] sm:$0xff] %v1004_v19  ;;  %v1015_v21 = vadd.f32 %v1260_v20, %v936_v15 }
 0x341   :  { %v1006_v22 = vpop.f32.mrf.mxu0 }
 0x342   :  { %1021 = vst [vmem:[#allocation10 + $0x18] sm:$0xff] %v1015_v21  ;;  %v1007_v23 = vadd.f32 %v1006_v22, %v936_v15 }
 0x344   :  { %1019 = vst [vmem:[#allocation10 + $0x8] sm:$0xff] %v1007_v23 }
 0x345   :  { %1440 = shalt.err (!%p1437_p10)
}
 0x346   :  { %1033 = dma.vmem_to_hbm [thread:$0]  %s1028_s3, 512, %s1532_s4, [#allocation4], %s1464_s5, %s1464_s5, %s1465_s6  }
 0x347   :  { %1455 = dma.done.wait [#allocation4], 512  }
 0x348   :  { %1456 = vsyncadd [#allocation4], 4294966784 }
 0x349   :  { %1037 = vsyncpa [#allocation3], 1 }
 0x34a   :  { %1038 = vsyncpa [#allocation6], 1 }
 0x34b   :  { %1039 = vsyncpa [#allocation9], 1 }
 0x34c   :  { %1040 = vsyncpa [#allocation4], 1 }

</bundles_post_ra>
